<compile_context>
chip_gen: v6e
topology: v6e:2x2x1
jax: 0.10.0
libtpu: 0.0.40
codegen_flags: <defaults>
</compile_context>

<pallas_src>
import functools

import jax
import jax.numpy as jnp
from jax import lax
from jax.experimental import pallas as pl
from jax.experimental.pallas import tpu as pltpu


def _gather_rows(ids_ref, emb_ref, out_ref):
    """Gather out_ref[b, :] = emb_ref[clamp(ids[b]), :] for all b (unrolled)."""
    B = out_ref.shape[0]
    V = emb_ref.shape[0]

    def body(b, carry):
        idx = jnp.clip(ids_ref[b], 0, V - 1)
        out_ref[pl.ds(b, 1), :] = emb_ref[pl.ds(idx, 1), :]
        return carry

    # B is small and static -> fully unroll so the LLO scheduler sees straight-line code.
    lax.fori_loop(0, B, body, 0, unroll=True)


def _embed_kernel(ids_ref, emb_ref, out_ref):
    # Plain embedding lookup: gather only, no normalization, no gamma/beta inputs.
    _gather_rows(ids_ref, emb_ref, out_ref)


def _embed_ln_kernel(ids_ref, emb_ref, gamma_ref, beta_ref, out_ref, *, eps):
    # Gather all rows into the (B, D) output block, then LayerNorm the whole block.
    _gather_rows(ids_ref, emb_ref, out_ref)

    x = out_ref[...].astype(jnp.float32)                    # (B, D), sublane-dense
    inv_d = jnp.float32(1.0 / x.shape[-1])

    # One-pass mean / variance: var = E[x^2] - mean^2 (single fused reduction pass).
    s1 = jnp.sum(x, axis=-1, keepdims=True)                 # (B, 1)
    s2 = jnp.sum(x * x, axis=-1, keepdims=True)             # (B, 1)
    mean = s1 * inv_d
    var = s2 * inv_d - mean * mean
    inv = lax.rsqrt(var + eps)                              # EUP slot

    g = gamma_ref[...].astype(jnp.float32)                  # (1, D) broadcasts over B
    b = beta_ref[...].astype(jnp.float32)
    out_ref[...] = ((x - mean) * inv * g + b).astype(out_ref.dtype)


def sentence_embedding_forward(sentence_id, emb_table, gamma=None, beta=None,
                               *, eps=1e-12, use_layernorm=True):
    """sentence_id: (B,) int; emb_table: (V, D); gamma/beta: (1, D). Returns (B, D)."""
    B = sentence_id.shape[0]
    V, D = emb_table.shape
    ids = sentence_id.astype(jnp.int32)

    if use_layernorm:
        kernel = functools.partial(_embed_ln_kernel, eps=eps)
        in_specs = [
            pl.BlockSpec((V, D), lambda i, ids: (0, 0)),     # full table resident in VMEM
            pl.BlockSpec((1, D), lambda i, ids: (0, 0)),     # gamma
            pl.BlockSpec((1, D), lambda i, ids: (0, 0)),     # beta
        ]
        args = (ids, emb_table, gamma, beta)
    else:
        kernel = _embed_kernel
        in_specs = [
            pl.BlockSpec((V, D), lambda i, ids: (0, 0)),     # full table resident in VMEM
        ]
        args = (ids, emb_table)

    return pl.pallas_call(
        kernel,
        out_shape=jax.ShapeDtypeStruct((B, D), emb_table.dtype),
        grid_spec=pltpu.PrefetchScalarGridSpec(
            num_scalar_prefetch=1,          # sentence ids land in SMEM
            grid=(1,),                      # single step: one DMA-in, one LN, one store
            in_specs=in_specs,
            out_specs=pl.BlockSpec((B, D), lambda i, ids: (0, 0)),
        ),
        compiler_params=pltpu.CompilerParams(
            dimension_semantics=("arbitrary",)),
    )(*args)


if __name__ == "__main__":
    # Small config consistent with the module:
    #   corpora_size=64, prompt_length=8, sent_embed_size=32 -> D=256, batch B=8
    corpora_size = 64
    prompt_length = 8
    sent_embed_size = 32
    D = prompt_length * sent_embed_size
    B = 8
    eps = 1e-12  # plm_config.layer_norm_eps

    key = jax.random.PRNGKey(0)
    k_emb, k_ids = jax.random.split(key)

    # Deterministic "normal_init_embedding(mean=0, std=0.02)"-style init.
    emb_table = (0.02 * jax.random.normal(k_emb, (corpora_size, D))).astype(jnp.float32)
    gamma = jnp.ones((1, D), jnp.float32)   # nn.LayerNorm weight init
    beta = jnp.zeros((1, D), jnp.float32)   # nn.LayerNorm bias init
    sentence_id = jax.random.randint(k_ids, (B,), 0, corpora_size, dtype=jnp.int32)

    # Path 1: optimizer_name == 'sgd_layernorm'  -> layer_norm(embedding(id))
    out_ln = sentence_embedding_forward(sentence_id, emb_table, gamma, beta,
                                        eps=eps, use_layernorm=True)
    out_ln = jax.block_until_ready(out_ln)

    # Path 2: any other optimizer -> plain embedding lookup (no gamma/beta passed)
    out_plain = sentence_embedding_forward(sentence_id, emb_table,
                                           eps=eps, use_layernorm=False)
    out_plain = jax.block_until_ready(out_plain)

    # Pure-JAX reference check
    ref_gather = emb_table[sentence_id]
    mu = jnp.mean(ref_gather, axis=-1, keepdims=True)
    va = jnp.mean((ref_gather - mu) ** 2, axis=-1, keepdims=True)
    ref_ln = (ref_gather - mu) * jax.lax.rsqrt(va + eps) * gamma + beta

    assert jnp.allclose(out_plain, ref_gather, atol=1e-6), "embedding path mismatch"
    assert jnp.allclose(out_ln, ref_ln, atol=2e-5), "layernorm path mismatch"

    print("KERNEL_OK")
</pallas_src>

<mosaic_0001>
module attributes {stable_mosaic.version = 11 : i64} {
  func.func @_embed_ln_kernel(%arg0: i32, %arg1: memref<8xi32, #tpu.memory_space<smem>>, %arg2: memref<64x256xf32, #tpu.memory_space<vmem>>, %arg3: memref<1x256xf32, #tpu.memory_space<vmem>>, %arg4: memref<1x256xf32, #tpu.memory_space<vmem>>, %arg5: memref<8x256xf32, #tpu.memory_space<vmem>>) attributes {dimension_semantics = [#tpu.dimension_semantics<arbitrary>], iteration_bounds = array<i64: 1>, scalar_prefetch = 1 : i64, scratch_operands = 0 : i64, tpu.core_type = #tpu.core_type<tc>, window_params = [{pipeline_mode = #tpu.pipeline_mode<synchronous>, transform_indices = @transform_0, window_bounds = array<i64: 64, 256>}, {pipeline_mode = #tpu.pipeline_mode<synchronous>, transform_indices = @transform_1, window_bounds = array<i64: 1, 256>}, {pipeline_mode = #tpu.pipeline_mode<synchronous>, transform_indices = @transform_2, window_bounds = array<i64: 1, 256>}, {pipeline_mode = #tpu.pipeline_mode<synchronous>, transform_indices = @transform_3, window_bounds = array<i64: 8, 256>}]} {
    %c0_i32 = arith.constant 0 : i32
    %0 = arith.index_cast %c0_i32 : i32 to index
    %1 = memref.load %arg1[%0] : memref<8xi32, #tpu.memory_space<smem>>
    %c0_i32_0 = arith.constant 0 : i32
    %c63_i32 = arith.constant 63 : i32
    %2 = arith.maxsi %c0_i32_0, %1 : i32
    %3 = arith.minsi %c63_i32, %2 : i32
    %4 = arith.index_cast %3 : i32 to index
    %c0 = arith.constant 0 : index
    %5 = vector.load %arg2[%4, %c0] : memref<64x256xf32, #tpu.memory_space<vmem>>, vector<1x256xf32>
    %6 = arith.index_cast %c0_i32 : i32 to index
    %c0_1 = arith.constant 0 : index
    %7 = vector.load %arg5[%6, %c0_1] : memref<8x256xf32, #tpu.memory_space<vmem>>, vector<1x256xf32>
    tpu.vector_store %arg5[%6, %c0_1], %5 {strides = array<i32>} : memref<8x256xf32, #tpu.memory_space<vmem>>, vector<1x256xf32>,
    %c1_i32 = arith.constant 1 : i32
    %8 = arith.index_cast %c1_i32 : i32 to index
    %9 = memref.load %arg1[%8] : memref<8xi32, #tpu.memory_space<smem>>
    %c0_i32_2 = arith.constant 0 : i32
    %c63_i32_3 = arith.constant 63 : i32
    %10 = arith.maxsi %c0_i32_2, %9 : i32
    %11 = arith.minsi %c63_i32_3, %10 : i32
    %12 = arith.index_cast %11 : i32 to index
    %c0_4 = arith.constant 0 : index
    %13 = vector.load %arg2[%12, %c0_4] : memref<64x256xf32, #tpu.memory_space<vmem>>, vector<1x256xf32>
    %14 = arith.index_cast %c1_i32 : i32 to index
    %c0_5 = arith.constant 0 : index
    %15 = vector.load %arg5[%14, %c0_5] : memref<8x256xf32, #tpu.memory_space<vmem>>, vector<1x256xf32>
    tpu.vector_store %arg5[%14, %c0_5], %13 {strides = array<i32>} : memref<8x256xf32, #tpu.memory_space<vmem>>, vector<1x256xf32>,
    %c2_i32 = arith.constant 2 : i32
    %16 = arith.index_cast %c2_i32 : i32 to index
    %17 = memref.load %arg1[%16] : memref<8xi32, #tpu.memory_space<smem>>
    %c0_i32_6 = arith.constant 0 : i32
    %c63_i32_7 = arith.constant 63 : i32
    %18 = arith.maxsi %c0_i32_6, %17 : i32
    %19 = arith.minsi %c63_i32_7, %18 : i32
    %20 = arith.index_cast %19 : i32 to index
    %c0_8 = arith.constant 0 : index
    %21 = vector.load %arg2[%20, %c0_8] : memref<64x256xf32, #tpu.memory_space<vmem>>, vector<1x256xf32>
    %22 = arith.index_cast %c2_i32 : i32 to index
    %c0_9 = arith.constant 0 : index
    %23 = vector.load %arg5[%22, %c0_9] : memref<8x256xf32, #tpu.memory_space<vmem>>, vector<1x256xf32>
    tpu.vector_store %arg5[%22, %c0_9], %21 {strides = array<i32>} : memref<8x256xf32, #tpu.memory_space<vmem>>, vector<1x256xf32>,
    %c3_i32 = arith.constant 3 : i32
    %24 = arith.index_cast %c3_i32 : i32 to index
    %25 = memref.load %arg1[%24] : memref<8xi32, #tpu.memory_space<smem>>
    %c0_i32_10 = arith.constant 0 : i32
    %c63_i32_11 = arith.constant 63 : i32
    %26 = arith.maxsi %c0_i32_10, %25 : i32
    %27 = arith.minsi %c63_i32_11, %26 : i32
    %28 = arith.index_cast %27 : i32 to index
    %c0_12 = arith.constant 0 : index
    %29 = vector.load %arg2[%28, %c0_12] : memref<64x256xf32, #tpu.memory_space<vmem>>, vector<1x256xf32>
    %30 = arith.index_cast %c3_i32 : i32 to index
    %c0_13 = arith.constant 0 : index
    %31 = vector.load %arg5[%30, %c0_13] : memref<8x256xf32, #tpu.memory_space<vmem>>, vector<1x256xf32>
    tpu.vector_store %arg5[%30, %c0_13], %29 {strides = array<i32>} : memref<8x256xf32, #tpu.memory_space<vmem>>, vector<1x256xf32>,
    %c4_i32 = arith.constant 4 : i32
    %32 = arith.index_cast %c4_i32 : i32 to index
    %33 = memref.load %arg1[%32] : memref<8xi32, #tpu.memory_space<smem>>
    %c0_i32_14 = arith.constant 0 : i32
    %c63_i32_15 = arith.constant 63 : i32
    %34 = arith.maxsi %c0_i32_14, %33 : i32
    %35 = arith.minsi %c63_i32_15, %34 : i32
    %36 = arith.index_cast %35 : i32 to index
    %c0_16 = arith.constant 0 : index
    %37 = vector.load %arg2[%36, %c0_16] : memref<64x256xf32, #tpu.memory_space<vmem>>, vector<1x256xf32>
    %38 = arith.index_cast %c4_i32 : i32 to index
    %c0_17 = arith.constant 0 : index
    %39 = vector.load %arg5[%38, %c0_17] : memref<8x256xf32, #tpu.memory_space<vmem>>, vector<1x256xf32>
    tpu.vector_store %arg5[%38, %c0_17], %37 {strides = array<i32>} : memref<8x256xf32, #tpu.memory_space<vmem>>, vector<1x256xf32>,
    %c5_i32 = arith.constant 5 : i32
    %40 = arith.index_cast %c5_i32 : i32 to index
    %41 = memref.load %arg1[%40] : memref<8xi32, #tpu.memory_space<smem>>
    %c0_i32_18 = arith.constant 0 : i32
    %c63_i32_19 = arith.constant 63 : i32
    %42 = arith.maxsi %c0_i32_18, %41 : i32
    %43 = arith.minsi %c63_i32_19, %42 : i32
    %44 = arith.index_cast %43 : i32 to index
    %c0_20 = arith.constant 0 : index
    %45 = vector.load %arg2[%44, %c0_20] : memref<64x256xf32, #tpu.memory_space<vmem>>, vector<1x256xf32>
    %46 = arith.index_cast %c5_i32 : i32 to index
    %c0_21 = arith.constant 0 : index
    %47 = vector.load %arg5[%46, %c0_21] : memref<8x256xf32, #tpu.memory_space<vmem>>, vector<1x256xf32>
    tpu.vector_store %arg5[%46, %c0_21], %45 {strides = array<i32>} : memref<8x256xf32, #tpu.memory_space<vmem>>, vector<1x256xf32>,
    %c6_i32 = arith.constant 6 : i32
    %48 = arith.index_cast %c6_i32 : i32 to index
    %49 = memref.load %arg1[%48] : memref<8xi32, #tpu.memory_space<smem>>
    %c0_i32_22 = arith.constant 0 : i32
    %c63_i32_23 = arith.constant 63 : i32
    %50 = arith.maxsi %c0_i32_22, %49 : i32
    %51 = arith.minsi %c63_i32_23, %50 : i32
    %52 = arith.index_cast %51 : i32 to index
    %c0_24 = arith.constant 0 : index
    %53 = vector.load %arg2[%52, %c0_24] : memref<64x256xf32, #tpu.memory_space<vmem>>, vector<1x256xf32>
    %54 = arith.index_cast %c6_i32 : i32 to index
    %c0_25 = arith.constant 0 : index
    %55 = vector.load %arg5[%54, %c0_25] : memref<8x256xf32, #tpu.memory_space<vmem>>, vector<1x256xf32>
    tpu.vector_store %arg5[%54, %c0_25], %53 {strides = array<i32>} : memref<8x256xf32, #tpu.memory_space<vmem>>, vector<1x256xf32>,
    %c7_i32 = arith.constant 7 : i32
    %56 = arith.index_cast %c7_i32 : i32 to index
    %57 = memref.load %arg1[%56] : memref<8xi32, #tpu.memory_space<smem>>
    %c0_i32_26 = arith.constant 0 : i32
    %c63_i32_27 = arith.constant 63 : i32
    %58 = arith.maxsi %c0_i32_26, %57 : i32
    %59 = arith.minsi %c63_i32_27, %58 : i32
    %60 = arith.index_cast %59 : i32 to index
    %c0_28 = arith.constant 0 : index
    %61 = vector.load %arg2[%60, %c0_28] : memref<64x256xf32, #tpu.memory_space<vmem>>, vector<1x256xf32>
    %62 = arith.index_cast %c7_i32 : i32 to index
    %c0_29 = arith.constant 0 : index
    %63 = vector.load %arg5[%62, %c0_29] : memref<8x256xf32, #tpu.memory_space<vmem>>, vector<1x256xf32>
    tpu.vector_store %arg5[%62, %c0_29], %61 {strides = array<i32>} : memref<8x256xf32, #tpu.memory_space<vmem>>, vector<1x256xf32>,
    %c8_i32 = arith.constant 8 : i32
    %c0_30 = arith.constant 0 : index
    %c0_31 = arith.constant 0 : index
    %64 = vector.load %arg5[%c0_30, %c0_31] : memref<8x256xf32, #tpu.memory_space<vmem>>, vector<8x256xf32>
    %cst = arith.constant dense<0.000000e+00> : vector<8xf32>
    %65 = vector.multi_reduction <add>, %64, %cst [1] : vector<8x256xf32> to vector<8xf32>
    %66 = vector.shape_cast %65 : vector<8xf32> to vector<8x1xf32>
    %67 = arith.mulf %64, %64 : vector<8x256xf32>
    %cst_32 = arith.constant dense<0.000000e+00> : vector<8xf32>
    %68 = vector.multi_reduction <add>, %67, %cst_32 [1] : vector<8x256xf32> to vector<8xf32>
    %69 = vector.shape_cast %68 : vector<8xf32> to vector<8x1xf32>
    %cst_33 = arith.constant 3.906250e-03 : f32
    %70 = vector.broadcast %cst_33 : f32 to vector<8x1xf32>
    %71 = arith.mulf %66, %70 : vector<8x1xf32>
    %cst_34 = arith.constant 3.906250e-03 : f32
    %72 = vector.broadcast %cst_34 : f32 to vector<8x1xf32>
    %73 = arith.mulf %69, %72 : vector<8x1xf32>
    %74 = arith.mulf %71, %71 : vector<8x1xf32>
    %75 = arith.subf %73, %74 : vector<8x1xf32>
    %cst_35 = arith.constant 9.99999996E-13 : f32
    %76 = vector.broadcast %cst_35 : f32 to vector<8x1xf32>
    %77 = arith.addf %75, %76 : vector<8x1xf32>
    %78 = math.rsqrt %77 : vector<8x1xf32>
    %c0_36 = arith.constant 0 : index
    %c0_37 = arith.constant 0 : index
    %79 = vector.load %arg3[%c0_36, %c0_37] : memref<1x256xf32, #tpu.memory_space<vmem>>, vector<1x256xf32>
    %c0_38 = arith.constant 0 : index
    %c0_39 = arith.constant 0 : index
    %80 = vector.load %arg4[%c0_38, %c0_39] : memref<1x256xf32, #tpu.memory_space<vmem>>, vector<1x256xf32>
    %81 = vector.broadcast %71 : vector<8x1xf32> to vector<8x256xf32>
    %82 = arith.subf %64, %81 : vector<8x256xf32>
    %83 = vector.broadcast %78 : vector<8x1xf32> to vector<8x256xf32>
    %84 = arith.mulf %82, %83 : vector<8x256xf32>
    %85 = vector.broadcast %79 : vector<1x256xf32> to vector<8x256xf32>
    %86 = arith.mulf %84, %85 : vector<8x256xf32>
    %87 = vector.broadcast %80 : vector<1x256xf32> to vector<8x256xf32>
    %88 = arith.addf %86, %87 : vector<8x256xf32>
    %c0_40 = arith.constant 0 : index
    %c0_41 = arith.constant 0 : index
    %89 = vector.load %arg5[%c0_40, %c0_41] : memref<8x256xf32, #tpu.memory_space<vmem>>, vector<8x256xf32>
    tpu.vector_store %arg5[%c0_40, %c0_41], %88 {strides = array<i32>} : memref<8x256xf32, #tpu.memory_space<vmem>>, vector<8x256xf32>,
    return
  }
  func.func @transform_0(%arg0: i32, %arg1: memref<8xi32, #tpu.memory_space<smem>>) -> (i32, i32) {
    %c0_i32 = arith.constant 0 : i32
    %c0_i32_0 = arith.constant 0 : i32
    %c0_i32_1 = arith.constant 0 : i32
    return %c0_i32, %c0_i32_0 : i32, i32
  }
  func.func @transform_1(%arg0: i32, %arg1: memref<8xi32, #tpu.memory_space<smem>>) -> (i32, i32) {
    %c0_i32 = arith.constant 0 : i32
    %c0_i32_0 = arith.constant 0 : i32
    %c0_i32_1 = arith.constant 0 : i32
    return %c0_i32, %c0_i32_0 : i32, i32
  }
  func.func @transform_2(%arg0: i32, %arg1: memref<8xi32, #tpu.memory_space<smem>>) -> (i32, i32) {
    %c0_i32 = arith.constant 0 : i32
    %c0_i32_0 = arith.constant 0 : i32
    %c0_i32_1 = arith.constant 0 : i32
    return %c0_i32, %c0_i32_0 : i32, i32
  }
  func.func @transform_3(%arg0: i32, %arg1: memref<8xi32, #tpu.memory_space<smem>>) -> (i32, i32) {
    %c0_i32 = arith.constant 0 : i32
    %c0_i32_0 = arith.constant 0 : i32
    %c0_i32_1 = arith.constant 0 : i32
    return %c0_i32, %c0_i32_0 : i32, i32
  }
}

</mosaic_0001>

<bundles_post_ra>
// kernel: tpu_custom_call.1
= control target key start
LH: loop header
LB: loop body
LE: loop exit
PB: predicated region body
PF: predicated region fallthrough
CT: control target
= control target key end

     0   :  { %s410_s15 = smov [#allocation3]   ;;  %s509_s0 = inlined_call_operand.hbm [shape: s32[8], index: 0, kind: input, shape index: {}]   ;;  %s510_s1 = inlined_call_operand.hbm [shape: f32[64,256], index: 1, kind: input, shape index: {}]   ;;  %s511_s2 = inlined_call_operand.vmem [shape: f32[1,256], index: 2, kind: input, shape index: {}]   ;;  %s512_s3 = inlined_call_operand.vmem [shape: f32[1,256], index: 3, kind: input, shape index: {}]   ;;  %s513_s4 = inlined_call_operand.hbm [shape: f32[8,256], index: 4, kind: output, shape index: {}]  }
   0x1   :  { %10 = dma.hbm_to_smem %s509_s0, 16, %s410_s15, [#allocation2] }
   0x2   :  { %404 = dma.done.wait [#allocation2], 16 }
   0x3   :  { %405 = vsyncadd [#allocation2], 4294967280 }
   0x4   :  { %12 = sfence }
   0x5   :  { %13 = vsyncpa [#allocation5], 0 }
   0x6   :  { %14 = vsyncpa [#allocation6], 0  ;;  %s411_s18 = smov [#allocation4]  }
   0x7   :  { %s20_s19 = sshll.u32 %s411_s18, 4  ;;  %s21_s19 = int_to_ptr.vmem [resolvable:$true] %s20_s19 }
   0x8   :  { %s372_s20 = scalar_lea.vmem %s21_s19, 2048  ;;  %p377_p1 = scmp.lt.s32.totalorder %s21_s19, %s21_s19 }
   0x9   :  { %p373_p0 = scmp.ne.s32.totalorder %s21_s19, %s372_s20  ;;  %p378_p2 = scmp.lt.s32.totalorder %s372_s20, %s372_s20 }
   0xb   :  { %p379_p3 = por %p378_p2, %p377_p1 }
   0xd   :  { %p380_p4 = pnand %p379_p3, %p373_p0 }
   0xf   :  { %383 = shalt.err (!%p380_p4)
}
  0x10   :  { %s412_s21 = smov 256   ;;  %s413_s22 = smov 16  }
  0x11   :  { %26 = dma.hbm_to_vmem [thread:$0]  %s510_s1, 2048, %s21_s19, [#allocation5], %s412_s21, %s412_s21, %s413_s22  }
  0x12   :  { %406 = dma.done.wait [#allocation5], 2048  }
  0x13   :  { %407 = vsyncadd [#allocation5], 4294965248  ;;  %s34_s0 = sld [smem:[#allocation3]]  ;;  %v48_v0 = vlaneseq  ;;  %v189_v26 = vld [vmem:[%s511_s2] sm:$0x3] }
  0x14   :  { %s269_s25 = sld [smem:[#allocation3 + $0x1]]  ;;  %v190_v27 = vld [vmem:[%s512_s3] sm:$0x3] }
  0x15   :  { %s446_s26 = sld [smem:[#allocation3 + $0x2]]  ;;  %vm455_vm0 = vcmp.lt.s32.totalorder %v48_v0, 256  ;;  %v197_v23 = vshrl.u32 %v48_v0, 7 }
  0x16   :  { %s448_s27 = sld [smem:[#allocation3 + $0x3]] }
  0x17   :  { %s450_s28 = sld [smem:[#allocation3 + $0x4]]  ;;  %v198_v24 = vsub.s32 0, %v197_v23  ;;  %v202_v25 = vsub.s32 1, %v197_v23 }
  0x18   :  { %s452_s29 = sld [smem:[#allocation3 + $0x5]] }
  0x19   :  { %p35_p5 = scmp.gt.s32.totalorder %s34_s0, 0  ;;  %p262_p6 = scmp.lt.s32.totalorder %s34_s0, 63  ;;  %v199_v30 = vrot.slane %v189_v26, %v198_v24  ;;  %v203_v31 = vrot.slane %v189_v26, %v202_v25  ;;  %v212_v33 = vrot.slane %v190_v27, %v198_v24  ;;  %v216_v34 = vrot.slane %v190_v27, %v202_v25 }
  0x1a   :  { %p55_p7 = scmp.gt.s32.totalorder %s269_s25, 0  ;;  %p270_p8 = scmp.lt.s32.totalorder %s269_s25, 63 }
  0x1b   :  { %s517_s0 = smov (!%p35_p5, %s34_s0), 0  ;;  %p72_p9 = scmp.gt.s32.totalorder %s446_s26, 0 }
  0x1c   :  { %s519_s25 = smov (!%p55_p7, %s269_s25), 0  ;;  %s521_s0 = smov (!%p262_p6, %s517_s0), 63 }
  0x1d   :  { %s523_s25 = smov (!%p270_p8, %s519_s25), 63  ;;  %s39_s1 = sshra.s32 %s521_s0, 3 }
  0x1e   :  { %s42_s30 = sand.u32 7, %s521_s0  ;;  %s327_s5 = sshll.u32 %s39_s1, 4 }
  0x1f   :  { %s59_s6 = sshra.s32 %s523_s25, 3  ;;  %s45_s7 = sadd.s32 %s327_s5, %s42_s30 }
  0x20   :  { %s62_s8 = sand.u32 7, %s523_s25  ;;  %s330_s9 = sshll.u32 %s59_s6, 4 }
  0x21   :  { %s46_s10 = scalar_lea.vmem [#allocation4], %s45_s7  ;;  %s65_s11 = sadd.s32 %s330_s9, %s62_s8 }
  0x22   :  { %v47_v2 = vld [vmem:[%s46_s10] ss:$8 sm:$0x3]  ;;  %p278_p10 = scmp.lt.s32.totalorder %s446_s26, 63  ;;  %s66_s12 = scalar_lea.vmem [#allocation4], %s65_s11 }
  0x23   :  { %52 = vst.msk [vmem:[#allocation7] ss:$8 sm:$0x3] %vm455_vm0, %v47_v2  ;;  %v67_v3 = vld [vmem:[%s66_s12] ss:$8 sm:$0x3] }
  0x24   :  { %s525_s26 = smov (!%p72_p9, %s446_s26), 0  ;;  %69 = vst.msk [vmem:[#allocation7 + $0x1] ss:$8 sm:$0x3] %vm455_vm0, %v67_v3  ;;  %p89_p11 = scmp.gt.s32.totalorder %s448_s27, 0 }
  0x25   :  { %p286_p12 = scmp.lt.s32.totalorder %s448_s27, 63  ;;  %s527_s26 = smov (!%p278_p10, %s525_s26), 63 }
  0x26   :  { %s529_s27 = smov (!%p89_p11, %s448_s27), 0  ;;  %s76_s13 = sshra.s32 %s527_s26, 3 }
  0x27   :  { %s79_s14 = sand.u32 7, %s527_s26  ;;  %s333_s15 = sshll.u32 %s76_s13, 4 }
  0x28   :  { %p106_p13 = scmp.gt.s32.totalorder %s450_s28, 0  ;;  %s82_s16 = sadd.s32 %s333_s15, %s79_s14 }
  0x29   :  { %p294_p0 = scmp.lt.s32.totalorder %s450_s28, 63  ;;  %p123_p1 = scmp.gt.s32.totalorder %s452_s29, 0 }
  0x2a   :  { %s83_s17 = scalar_lea.vmem [#allocation4], %s82_s16  ;;  %s531_s27 = smov (!%p286_p12, %s529_s27), 63 }
  0x2b   :  { %v84_v4 = vld [vmem:[%s83_s17] ss:$8 sm:$0x3]  ;;  %s107_s18 = scalar_select %p106_p13, %s450_s28, 0 }
  0x2c   :  { %86 = vst.msk [vmem:[#allocation7 + $0x2] ss:$8 sm:$0x3] %vm455_vm0, %v84_v4  ;;  %s93_s19 = sshra.s32 %s531_s27, 3  ;;  %s96_s20 = sand.u32 7, %s531_s27 }
  0x2d   :  { %s336_s21 = sshll.u32 %s93_s19, 4  ;;  %p302_p2 = scmp.lt.s32.totalorder %s452_s29, 63 }
  0x2e   :  { %s99_s22 = sadd.s32 %s336_s21, %s96_s20  ;;  %s309_s23 = sld [smem:[#allocation3 + $0x6]] }
  0x2f   :  { %s476_s24 = sld [smem:[#allocation3 + $0x7]]  ;;  %s100_s0 = scalar_lea.vmem [#allocation4], %s99_s22 }
  0x30   :  { %v101_v5 = vld [vmem:[%s100_s0] ss:$8 sm:$0x3]  ;;  %s533_s18 = smov (!%p294_p0, %s107_s18), 63 }
  0x31   :  { %103 = vst.msk [vmem:[#allocation7 + $0x3] ss:$8 sm:$0x3] %vm455_vm0, %v101_v5  ;;  %s124_s25 = scalar_select %p123_p1, %s452_s29, 0 }
  0x32   :  { %s110_s26 = sshra.s32 %s533_s18, 3  ;;  %s113_s27 = sand.u32 7, %s533_s18 }
  0x33   :  { %s339_s1 = sshll.u32 %s110_s26, 4  ;;  %s535_s25 = smov (!%p302_p2, %s124_s25), 63 }
  0x34   :  { %s116_s30 = sadd.s32 %s339_s1, %s113_s27  ;;  %p140_p3 = scmp.gt.s32.totalorder %s309_s23, 0 }
  0x35   :  { %p310_p4 = scmp.lt.s32.totalorder %s309_s23, 63  ;;  %s117_s5 = scalar_lea.vmem [#allocation4], %s116_s30 }
  0x36   :  { %v118_v6 = vld [vmem:[%s117_s5] ss:$8 sm:$0x3]  ;;  %s141_s28 = scalar_select %p140_p3, %s309_s23, 0 }
  0x37   :  { %120 = vst.msk [vmem:[#allocation7 + $0x4] ss:$8 sm:$0x3] %vm455_vm0, %v118_v6  ;;  %s127_s6 = sshra.s32 %s535_s25, 3  ;;  %s130_s7 = sand.u32 7, %s535_s25 }
  0x38   :  { %s342_s8 = sshll.u32 %s127_s6, 4  ;;  %p157_p5 = scmp.gt.s32.totalorder %s476_s24, 0 }
  0x39   :  { %s133_s9 = sadd.s32 %s342_s8, %s130_s7  ;;  %p318_p6 = scmp.lt.s32.totalorder %s476_s24, 63 }
  0x3a   :  { %s134_s10 = scalar_lea.vmem [#allocation4], %s133_s9  ;;  %s537_s28 = smov (!%p310_p4, %s141_s28), 63 }
  0x3b   :  { %v135_v7 = vld [vmem:[%s134_s10] ss:$8 sm:$0x3]  ;;  %s539_s24 = smov (!%p157_p5, %s476_s24), 0  ;;  %s144_s29 = sshra.s32 %s537_s28, 3 }
  0x3c   :  { %137 = vst.msk [vmem:[#allocation7 + $0x5] ss:$8 sm:$0x3] %vm455_vm0, %v135_v7  ;;  %s147_s11 = sand.u32 7, %s537_s28  ;;  %s345_s12 = sshll.u32 %s144_s29, 4 }
  0x3d   :  { %s150_s13 = sadd.s32 %s345_s12, %s147_s11  ;;  %s541_s24 = smov (!%p318_p6, %s539_s24), 63 }
  0x3e   :  { %s151_s14 = scalar_lea.vmem [#allocation4], %s150_s13  ;;  %s161_s15 = sshra.s32 %s541_s24, 3 }
  0x3f   :  { %v152_v8 = vld [vmem:[%s151_s14] ss:$8 sm:$0x3]  ;;  %s164_s16 = sand.u32 7, %s541_s24  ;;  %s348_s17 = sshll.u32 %s161_s15, 4 }
  0x40   :  { %154 = vst.msk [vmem:[#allocation7 + $0x6] ss:$8 sm:$0x3] %vm455_vm0, %v152_v8  ;;  %s167_s18 = sadd.s32 %s348_s17, %s164_s16  ;;  %s414_s24 = smov [#allocation7]  }
  0x41   :  { %s168_s19 = scalar_lea.vmem [#allocation4], %s167_s18  ;;  %s229_s0 = sshll.u32 %s414_s24, 4  ;;  %s230_s0 = int_to_ptr.vmem [resolvable:$true] %s229_s0 }
  0x42   :  { %v169_v9 = vld [vmem:[%s168_s19] ss:$8 sm:$0x3]  ;;  %s384_s2 = scalar_lea.vmem %s230_s0, 256  ;;  %p389_p8 = scmp.lt.s32.totalorder %s230_s0, %s230_s0 }
  0x43   :  { %171 = vst.msk [vmem:[#allocation7 + $0x7] ss:$8 sm:$0x3] %vm455_vm0, %v169_v9  ;;  %p385_p7 = scmp.ne.s32.totalorder %s230_s0, %s384_s2  ;;  %p390_p9 = scmp.lt.s32.totalorder %s384_s2, %s384_s2 }
  0x45   :  { %p391_p10 = por %p390_p9, %p389_p8 }
  0x47   :  { %p392_p11 = pnand %p391_p10, %p385_p7 }
  0x4a   :  { %v173_v10 = vld [vmem:[#allocation7] sm:$0xff]  ;;  %v174_v11 = vld [vmem:[#allocation7 + $0x8] sm:$0xff] }
  0x4b   :  { %v175_v12 = vadd.f32 %v174_v11, %v173_v10  ;;  %v178_v13 = vmul.f32 %v173_v10, %v173_v10  ;;  %v179_v14 = vmul.f32 %v174_v11, %v174_v11 }
  0x4d   :  { %176 = vadd.xlane.f32.xlu0 %v175_v12  ;;  %v180_v15 = vadd.f32 %v179_v14, %v178_v13 }
  0x51   :  { %181 = vadd.xlane.f32.xlu0 %v180_v15 }
  0xd6   :  { %v177_v16 = vpop.xlane.xlu0 %176 }
  0xd7   :  { %v183_v17 = vmul.f32 0.00390625, %v177_v16 }
  0xd9   :  { %v185_v19 = vmul.f32 %v183_v17, %v183_v17  ;;  %v191_v28 = vsub.f32 %v173_v10, %v183_v17  ;;  %v192_v29 = vsub.f32 %v174_v11, %v183_v17 }
  0xda   :  { %v182_v18 = vpop.xlane.xlu0 %181 }
  0xdb   :  { %v184_v20 = vmul.f32 0.00390625, %v182_v18 }
  0xdd   :  { %v186_v21 = vsub.f32 %v184_v20, %v185_v19 }
  0xdf   :  { %v187_v22 = vadd.f32 1e-12, %v186_v21 }
  0xe1   :  { %354 = vrsqrt.f32 %v187_v22 }
  0xee   :  { %v355_v32 = vpop.eup %354 }
  0xef   :  { %v193_v35 = vmul.f32 %v355_v32, %v191_v28  ;;  %v194_v36 = vmul.f32 %v355_v32, %v192_v29 }
  0xf1   :  { %v206_v37 = vmul.f32 %v199_v30, %v193_v35  ;;  %v207_v38 = vmul.f32 %v203_v31, %v194_v36 }
  0xf3   :  { %v219_v39 = vadd.f32 %v212_v33, %v206_v37  ;;  %v220_v40 = vadd.f32 %v216_v34, %v207_v38 }
  0xf5   :  { %221 = vst [vmem:[#allocation7] sm:$0xff] %v219_v39  ;;  %222 = vst [vmem:[#allocation7 + $0x8] sm:$0xff] %v220_v40 }
  0xf6   :  { %395 = shalt.err (!%p392_p11)
}
  0xf7   :  { %232 = dma.vmem_to_hbm [thread:$0]  %s230_s0, 256, %s513_s4, [#allocation6]  }
  0xf8   :  { %408 = dma.done.wait [#allocation6], 256  }
  0xf9   :  { %409 = vsyncadd [#allocation6], 4294967040 }
  0xfa   :  { %236 = vsyncpa [#allocation5], 1 }
  0xfb   :  { %237 = vsyncpa [#allocation6], 1 }

</bundles_post_ra>
